<compile_context>
chip_gen: v7x
topology: tpu7x:2x2x1
jax: 0.10.0
libtpu: 0.0.40
codegen_flags: <defaults>
</compile_context>

<pallas_src>
import functools

import jax
import jax.numpy as jnp
from jax.experimental import pallas as pl
from jax.experimental.pallas import tpu as pltpu


# ------------------------------ helpers ------------------------------------ #
def _round_up(x, m):
    return ((x + m - 1) // m) * m


def _pick_divisor(dim, candidates):
    for c in candidates:
        if c <= dim and dim % c == 0:
            return c
    return dim


# ----------------------------- Pallas kernels ------------------------------ #
def _linear_kernel_multi_k(x_ref, w_ref, b_ref, o_ref, acc_ref, *, apply_relu):
    """One (tm, tn) output tile; K is the last (sequential) grid axis."""
    k = pl.program_id(2)

    @pl.when(k == 0)
    def _init():
        acc_ref[...] = jnp.zeros_like(acc_ref)

    # bf16 x bf16 -> f32 accumulate on the MXU.
    acc_ref[...] += jnp.dot(
        x_ref[...], w_ref[...], preferred_element_type=jnp.float32
    )

    @pl.when(k == pl.num_programs(2) - 1)
    def _finalize():
        out = acc_ref[...] + b_ref[...]          # f32 epilogue on accumulator
        if apply_relu:                           # static, baked at trace time
            out = jnp.maximum(out, 0.0)
        o_ref[...] = out.astype(o_ref.dtype)


def _linear_kernel_single_k(x_ref, w_ref, b_ref, o_ref, *, apply_relu):
    """K fits in one step: no accumulator scratch, no predicated regions."""
    out = jnp.dot(
        x_ref[...], w_ref[...], preferred_element_type=jnp.float32
    ) + b_ref[...]
    if apply_relu:
        out = jnp.maximum(out, 0.0)
    o_ref[...] = out.astype(o_ref.dtype)


# ----------------------------- host wrapper -------------------------------- #
@functools.partial(
    jax.jit, static_argnames=("n_out", "apply_relu", "out_dtype")
)
def _pallas_linear_padded(x, wp, bp, *, n_out, apply_relu, out_dtype):
    """y = x @ wp + bp (+ optional ReLU).

    `wp` (bf16) and `bp` (f32) are already lane-aligned/padded at module init;
    only the activation is cast/padded here.
    """
    M, K = x.shape
    Kp, Np = wp.shape
    assert K <= Kp and bp.shape == (1, Np)

    # ---- static tile selection (shapes are static under jit) ----
    tm = min(512, _round_up(M, 8))
    tn = _pick_divisor(Np, (512, 256, 128))       # prefer 256-wide MXU feeds
    tk = _pick_divisor(Kp, (1024, 512, 256, 128))
    Mp = _round_up(M, tm)

    # Keep >= 2 parallel output blocks so both v7x TensorCores get work;
    # for small M prefer splitting N.
    if (Mp // tm) * (Np // tn) < 2:
        if tn > 128 and Np % 128 == 0 and Np // 128 >= 2:
            half = Np // 2
            tn = half if half % 128 == 0 else 128
        elif tm > 8 and M > 8:
            tm = _round_up(max(8, tm // 2), 8)
            Mp = _round_up(M, tm)

    grid_m, grid_n, grid_k = Mp // tm, Np // tn, Kp // tk

    # ---- per-call activation prep (the only runtime-varying operand) ----
    xp = x.astype(jnp.bfloat16)
    if Mp != M or Kp != K:
        xp = jnp.pad(xp, ((0, Mp - M), (0, Kp - K)))

    out_itemsize = jnp.dtype(out_dtype).itemsize
    # Accurate traffic: x re-read per N block, w re-read per M block.
    bytes_accessed = (
        Mp * Kp * 2 * grid_n
        + Kp * Np * 2 * grid_m
        + Np * 4 * grid_m
        + Mp * Np * out_itemsize
    )
    cost = pl.CostEstimate(
        flops=2 * Mp * Np * Kp, transcendentals=0, bytes_accessed=bytes_accessed
    )

    # VMEM budget: double-buffered operands + acc + double-buffered output,
    # with margin; capped at 44 MiB to stay safe on v7x (64 MiB physical).
    footprint = (
        2 * tm * tk * 2          # x tiles (bf16, double-buffered)
        + 2 * tk * tn * 2        # w tiles (bf16, double-buffered)
        + 2 * tn * 4             # bias tiles
        + tm * tn * 4            # f32 accumulator
        + 2 * tm * tn * out_itemsize
    )
    vmem_limit = min(max(2 * footprint, 32 * 1024 * 1024), 44 * 1024 * 1024)

    if grid_k == 1:
        # Small/shallow problems: one K step, all-parallel 2-D grid.
        kernel = functools.partial(_linear_kernel_single_k, apply_relu=apply_relu)
        out = pl.pallas_call(
            kernel,
            out_shape=jax.ShapeDtypeStruct((Mp, Np), out_dtype),
            grid=(grid_m, grid_n),
            in_specs=[
                pl.BlockSpec((tm, tk), lambda i, j: (i, 0)),    # x tile
                pl.BlockSpec((tk, tn), lambda i, j: (0, j)),    # w tile
                pl.BlockSpec((1, tn), lambda i, j: (0, j)),     # bias tile
            ],
            out_specs=pl.BlockSpec((tm, tn), lambda i, j: (i, j)),
            compiler_params=pltpu.CompilerParams(
                dimension_semantics=("parallel", "parallel"),
                vmem_limit_bytes=vmem_limit,
            ),
            cost_estimate=cost,
        )(xp, wp, bp)
    else:
        kernel = functools.partial(_linear_kernel_multi_k, apply_relu=apply_relu)
        out = pl.pallas_call(
            kernel,
            out_shape=jax.ShapeDtypeStruct((Mp, Np), out_dtype),
            grid=(grid_m, grid_n, grid_k),
            in_specs=[
                pl.BlockSpec((tm, tk), lambda i, j, k: (i, k)),   # x tile
                pl.BlockSpec((tk, tn), lambda i, j, k: (k, j)),   # w tile
                pl.BlockSpec((1, tn), lambda i, j, k: (0, j)),    # bias (j only)
            ],
            out_specs=pl.BlockSpec((tm, tn), lambda i, j, k: (i, j)),
            scratch_shapes=[pltpu.VMEM((tm, tn), jnp.float32)],
            compiler_params=pltpu.CompilerParams(
                dimension_semantics=("parallel", "parallel", "arbitrary"),
                vmem_limit_bytes=vmem_limit,
            ),
            cost_estimate=cost,
        )(xp, wp, bp)

    return out[:M, :n_out]


# ------------------------ Inner "module" (Linear) -------------------------- #
class PallasLinear:
    # Weight padding alignment: lane-dense + matches the 2x256x256 MXU.
    N_ALIGN = 256
    K_ALIGN = 256

    def __init__(self, key, in_features, out_features, out_dtype=jnp.float32):
        kw, kb = jax.random.split(key)
        scale = 1.0 / jnp.sqrt(jnp.float32(in_features))
        w = jax.random.uniform(kw, (in_features, out_features),
                               jnp.float32, -1.0, 1.0) * scale
        b = jax.random.uniform(kb, (1, out_features),
                               jnp.float32, -1.0, 1.0) * scale

        self.in_features = in_features
        self.out_features = out_features
        self.out_dtype = out_dtype

        Kp = _round_up(in_features, self.K_ALIGN)
        Np = _round_up(out_features, self.N_ALIGN)
        # Hoisted weight prep: bf16 cast + pad ONCE here, not per forward call.
        self.wp = jnp.pad(w.astype(jnp.bfloat16),
                          ((0, Kp - in_features), (0, Np - out_features)))
        self.bp = jnp.pad(b.astype(jnp.float32),
                          ((0, 0), (0, Np - out_features)))
        # f32 originals kept only for the reference check in __main__.
        self.w = w
        self.b = b

    def __call__(self, x, *, apply_relu=False):
        return _pallas_linear_padded(
            x, self.wp, self.bp,
            n_out=self.out_features,
            apply_relu=apply_relu,
            out_dtype=self.out_dtype,
        )


# ------------------- ForwardPassSettingWrapper (JAX port) ------------------ #
class ForwardPassSettingWrapper:
    """Exact semantic port: forward(*args) -> self.module(*args, **self.settings).

    Note: each distinct `settings` combination becomes a static kwarg for the
    kernel, so changing it triggers a (cached) retrace/recompile.
    """

    def __init__(self, module):
        self.module = module
        self.settings = {}

    def __call__(self, *args):
        return self.module(*args, **self.settings)


# ---------------------------------- main ----------------------------------- #
if __name__ == "__main__":
    key = jax.random.PRNGKey(0)
    k_x, k_mod, k_x2, k_mod2 = jax.random.split(key, 4)

    # ---- case 1: shallow K -> single-K-step specialized kernel ------------- #
    batch, seq, hidden_in, hidden_out = 2, 128, 512, 256
    x = jax.random.normal(k_x, (batch, seq, hidden_in), jnp.float32)
    x2d = x.reshape(batch * seq, hidden_in)   # glue reshape outside the kernel

    inner = PallasLinear(k_mod, hidden_in, hidden_out)
    wrapped = ForwardPassSettingWrapper(inner)

    y_plain = wrapped(x2d)                    # default settings: plain linear
    jax.block_until_ready(y_plain)

    wrapped.settings = {"apply_relu": True}   # wrapper-controlled kwarg
    y_relu = wrapped(x2d)
    jax.block_until_ready(y_relu)

    xb = x2d.astype(jnp.bfloat16).astype(jnp.float32)
    wb = inner.w.astype(jnp.bfloat16).astype(jnp.float32)
    ref_plain = xb @ wb + inner.b
    ref_relu = jnp.maximum(ref_plain, 0.0)

    assert y_plain.shape == (batch * seq, hidden_out)
    assert jnp.allclose(y_plain, ref_plain, atol=1e-2, rtol=1e-2)
    assert jnp.allclose(y_relu, ref_relu, atol=1e-2, rtol=1e-2)

    # ---- case 2: deeper K + non-aligned N -> multi-K accumulator kernel ---- #
    m2, k2_in, k2_out = 64, 2048, 384
    x2 = jax.random.normal(k_x2, (m2, k2_in), jnp.float32)
    inner2 = PallasLinear(k_mod2, k2_in, k2_out)
    wrapped2 = ForwardPassSettingWrapper(inner2)
    wrapped2.settings = {"apply_relu": True}

    y2 = wrapped2(x2)
    jax.block_until_ready(y2)

    xb2 = x2.astype(jnp.bfloat16).astype(jnp.float32)
    wb2 = inner2.w.astype(jnp.bfloat16).astype(jnp.float32)
    ref2 = jnp.maximum(xb2 @ wb2 + inner2.b, 0.0)

    assert y2.shape == (m2, k2_out)
    assert jnp.allclose(y2, ref2, atol=1e-2, rtol=1e-2)

    print("KERNEL_OK")
</pallas_src>

<mosaic_0001>
module attributes {stable_mosaic.version = 11 : i64} {
  func.func @_linear_kernel_single_k(%arg0: i32, %arg1: i32, %arg2: memref<256x512xbf16, #tpu.memory_space<vmem>>, %arg3: memref<512x128xbf16, #tpu.memory_space<vmem>>, %arg4: memref<1x128xf32, #tpu.memory_space<vmem>>, %arg5: memref<256x128xf32, #tpu.memory_space<vmem>>) attributes {dimension_semantics = [#tpu.dimension_semantics<parallel>, #tpu.dimension_semantics<parallel>], iteration_bounds = array<i64: 1, 2>, scalar_prefetch = 0 : i64, scratch_operands = 0 : i64, tpu.core_type = #tpu.core_type<tc>, window_params = [{transform_indices = @transform_0, window_bounds = array<i64: 256, 512>}, {transform_indices = @transform_1, window_bounds = array<i64: 512, 128>}, {transform_indices = @transform_2, window_bounds = array<i64: 1, 128>}, {transform_indices = @transform_3, window_bounds = array<i64: 256, 128>}]} {
    %c0 = arith.constant 0 : index
    %c0_0 = arith.constant 0 : index
    %0 = vector.load %arg2[%c0, %c0_0] : memref<256x512xbf16, #tpu.memory_space<vmem>>, vector<256x512xbf16>
    %c0_1 = arith.constant 0 : index
    %c0_2 = arith.constant 0 : index
    %1 = vector.load %arg3[%c0_1, %c0_2] : memref<512x128xbf16, #tpu.memory_space<vmem>>, vector<512x128xbf16>
    %cst = arith.constant dense<0.000000e+00> : vector<256x128xf32>
    %2 = tpu.matmul %0, %1, %cst {dimension_numbers = #tpu.dot_dimension_numbers<[1], [0], [0], [1], [0, 0, 1, 1], [], []>} : vector<256x512xbf16>, vector<512x128xbf16>, vector<256x128xf32> -> vector<256x128xf32>
    %c0_3 = arith.constant 0 : index
    %c0_4 = arith.constant 0 : index
    %3 = vector.load %arg4[%c0_3, %c0_4] : memref<1x128xf32, #tpu.memory_space<vmem>>, vector<1x128xf32>
    %4 = vector.broadcast %3 : vector<1x128xf32> to vector<256x128xf32>
    %5 = arith.addf %2, %4 : vector<256x128xf32>
    %c0_5 = arith.constant 0 : index
    %c0_6 = arith.constant 0 : index
    %6 = vector.load %arg5[%c0_5, %c0_6] : memref<256x128xf32, #tpu.memory_space<vmem>>, vector<256x128xf32>
    tpu.vector_store %arg5[%c0_5, %c0_6], %5 {strides = array<i32>} : memref<256x128xf32, #tpu.memory_space<vmem>>, vector<256x128xf32>,
    return
  }
  func.func @transform_0(%arg0: i32, %arg1: i32) -> (i32, i32) {
    %c0_i32 = arith.constant 0 : i32
    %c0_i32_0 = arith.constant 0 : i32
    return %arg0, %c0_i32 : i32, i32
  }
  func.func @transform_1(%arg0: i32, %arg1: i32) -> (i32, i32) {
    %c0_i32 = arith.constant 0 : i32
    %c0_i32_0 = arith.constant 0 : i32
    return %c0_i32, %arg1 : i32, i32
  }
  func.func @transform_2(%arg0: i32, %arg1: i32) -> (i32, i32) {
    %c0_i32 = arith.constant 0 : i32
    %c0_i32_0 = arith.constant 0 : i32
    return %c0_i32, %arg1 : i32, i32
  }
  func.func @transform_3(%arg0: i32, %arg1: i32) -> (i32, i32) {
    %c0_i32 = arith.constant 0 : i32
    return %arg0, %arg1 : i32, i32
  }
}

</mosaic_0001>

<bundles_post_ra>
// kernel: _pallas_linear_padded.1
= control target key start
LH: loop header
LB: loop body
LE: loop exit
PB: predicated region body
PF: predicated region fallthrough
CT: control target
= control target key end

     0   :  { %8 = vsyncpa [#allocation4], 0  ;;  %s2821_s0 = inlined_call_operand.vmem [shape: bf16[256,512], index: 0, kind: input, shape index: {}]   ;;  %s2822_s1 = inlined_call_operand.vmem [shape: bf16[512,256], index: 1, kind: input, shape index: {}]   ;;  %s2823_s2 = inlined_call_operand.vmem [shape: f32[1,256], index: 2, kind: input, shape index: {}]   ;;  %s2824_s3 = inlined_call_operand.hbm [shape: f32[256,256], index: 3, kind: output, shape index: {}]  }
   0x1   :  { %10 = vsyncpa [#allocation4 + $0x1], 0  ;;  %s2261_s12 = smov 0   ;;  %s2263_s13 = smov 0  }
   0x2   :  { %s2265_s14 = smov 0   ;;  %s2267_s15 = smov 0  }
   0x3   :  { %s2269_s16 = smov 0   ;;  %s2271_s17 = smov 0  }
   0x4 LB: > { %s1636_s18 = sadd.s32 4294967295, %s2235_s17   ;;  %s1637_s19 = sadd.s32 4294967294, %s2235_s17   ;;  %s2235_s17 = sphi %s2271_s17, %s16_s17   ;;  %s2231_s16 = sphi %s2269_s16, %s2831_s16   ;;  %s2227_s15 = sphi %s2267_s15, %s2830_s15   ;;  %s2223_s14 = sphi %s2265_s14, %s2829_s14   ;;  %s2219_s13 = sphi %s2263_s13, %s2828_s13   ;;  %s2215_s12 = sphi %s2261_s12, %s2827_s12  }
   0x5   : > { %s25_s20 = sadd.s32 1, %s2231_s16  ;;  %s61_s21 = sadd.s32 1, %s2223_s14 }
   0x6   : > { %p26_p0 = scmp.ge.s32.totalorder %s25_s20, 2  ;;  %p68_p1 = scmp.ne.s32.totalorder %s2223_s14, %s2219_s13 }
   0x7   : > { %p69_p2 = scmp.eq.s32.totalorder %s2235_s17, 0  ;;  %p126_p3 = scmp.eq.s32.totalorder %s1636_s18, 1 }
   0x8   : > { %s2833_s20 = smov (%p26_p0, %s25_s20), 0  ;;  %p131_p6 = scmp.ne.s32.totalorder %s2219_s13, %s2215_s12 }
   0x9   : > { %p70_p4 = por %p69_p2, %p68_p1  ;;  %p2300_p5 = por %p126_p3, %p68_p1 }
   0xa   : > { %s58_s23 = ssub.s32 %s2231_s16, %s2833_s20  ;;  %p132_p8 = scmp.eq.s32.totalorder %s1637_s19, 1 }
   0xb   : > { %p59_p7 = scmp.eq.s32.totalorder %s58_s23, 0  ;;  %p1640_p10 = scmp.ge.s32.totalorder %s2235_s17, 2 }
   0xc   : > { %p2311_p9 = por %p132_p8, %p131_p6 }
   0xd   : > { %s2309_s24 = scalar_select %p59_p7, %s2223_s14, %s61_s21  }
   0xe   : > { %158 = sbr.rel (%p1640_p10) target bundleno = 67 (0x43), region = 20 }
  0x15   : > { %161 = sbr.rel (!%p70_p4) target bundleno = 67 (0x43), region = 24  ;;  %s163_s26 = sand.u32 (%p70_p4), 1, %s2223_s14  }
  0x16   : > { %s1642_s27 = sshll.u32 (%p70_p4), %s2231_s16, 2  ;;  %s1641_s28 = sshll.u32 (%p70_p4), %s163_s26, 8 }
  0x17   : > { %s2323_s4 = scalar_lea.vmem (%p70_p4), %s2822_s1, %s1642_s27  ;;  %s2327_s5 = scalar_lea.vmem (%p70_p4), [#allocation2], %s1641_s28 }
  0x18   : > { %v183_v0 = vld [vmem:[%s2323_s4] sm:$0xf] (%p70_p4)  ;;  %v185_v1 = vld [vmem:[%s2323_s4 + $0x8] sm:$0xf] (%p70_p4)  ;;  %v187_v2 = vld [vmem:[%s2323_s4 + $0x10] sm:$0xf] (%p70_p4) }
  0x19   : > { %184 = vst [vmem:[%s2327_s5] sm:$0xf] (%p70_p4), %v183_v0  ;;  %186 = vst [vmem:[%s2327_s5 + $0x4] sm:$0xf] (%p70_p4), %v185_v1  ;;  %v189_v3 = vld [vmem:[%s2323_s4 + $0x18] sm:$0xf] (%p70_p4) }
  0x1a   : > { %v191_v4 = vld [vmem:[%s2323_s4 + $0x20] sm:$0xf] (%p70_p4)  ;;  %188 = vst [vmem:[%s2327_s5 + $0x8] sm:$0xf] (%p70_p4), %v187_v2  ;;  %190 = vst [vmem:[%s2327_s5 + $0xc] sm:$0xf] (%p70_p4), %v189_v3 }
  0x1b   : > { %192 = vst [vmem:[%s2327_s5 + $0x10] sm:$0xf] (%p70_p4), %v191_v4  ;;  %v193_v5 = vld [vmem:[%s2323_s4 + $0x28] sm:$0xf] (%p70_p4)  ;;  %v195_v6 = vld [vmem:[%s2323_s4 + $0x30] sm:$0xf] (%p70_p4) }
  0x1c   : > { %v197_v7 = vld [vmem:[%s2323_s4 + $0x38] sm:$0xf]  ;;  %194 = vst [vmem:[%s2327_s5 + $0x14] sm:$0xf] %v193_v5  ;;  %196 = vst [vmem:[%s2327_s5 + $0x18] sm:$0xf] %v195_v6 }
  0x1d   : > { %198 = vst [vmem:[%s2327_s5 + $0x1c] sm:$0xf] %v197_v7  ;;  %v199_v8 = vld [vmem:[%s2323_s4 + $0x40] sm:$0xf]  ;;  %v201_v9 = vld [vmem:[%s2323_s4 + $0x48] sm:$0xf] }
  0x1e   : > { %v203_v10 = vld [vmem:[%s2323_s4 + $0x50] sm:$0xf]  ;;  %200 = vst [vmem:[%s2327_s5 + $0x20] sm:$0xf] %v199_v8  ;;  %202 = vst [vmem:[%s2327_s5 + $0x24] sm:$0xf] %v201_v9 }
  0x1f   : > { %204 = vst [vmem:[%s2327_s5 + $0x28] sm:$0xf] %v203_v10  ;;  %v205_v11 = vld [vmem:[%s2323_s4 + $0x58] sm:$0xf]  ;;  %v207_v12 = vld [vmem:[%s2323_s4 + $0x60] sm:$0xf] }
  0x20   : > { %v209_v13 = vld [vmem:[%s2323_s4 + $0x68] sm:$0xf]  ;;  %206 = vst [vmem:[%s2327_s5 + $0x2c] sm:$0xf] %v205_v11  ;;  %208 = vst [vmem:[%s2327_s5 + $0x30] sm:$0xf] %v207_v12 }
  0x21   : > { %210 = vst [vmem:[%s2327_s5 + $0x34] sm:$0xf] %v209_v13  ;;  %v211_v14 = vld [vmem:[%s2323_s4 + $0x70] sm:$0xf]  ;;  %v213_v15 = vld [vmem:[%s2323_s4 + $0x78] sm:$0xf] }
  0x22   : > { %v215_v16 = vld [vmem:[%s2323_s4 + $0x80] sm:$0xf]  ;;  %212 = vst [vmem:[%s2327_s5 + $0x38] sm:$0xf] %v211_v14  ;;  %214 = vst [vmem:[%s2327_s5 + $0x3c] sm:$0xf] %v213_v15 }
  0x23   : > { %216 = vst [vmem:[%s2327_s5 + $0x40] sm:$0xf] %v215_v16  ;;  %v217_v17 = vld [vmem:[%s2323_s4 + $0x88] sm:$0xf]  ;;  %v219_v18 = vld [vmem:[%s2323_s4 + $0x90] sm:$0xf] }
  0x24   : > { %v221_v19 = vld [vmem:[%s2323_s4 + $0x98] sm:$0xf]  ;;  %218 = vst [vmem:[%s2327_s5 + $0x44] sm:$0xf] %v217_v17  ;;  %220 = vst [vmem:[%s2327_s5 + $0x48] sm:$0xf] %v219_v18 }
  0x25   : > { %222 = vst [vmem:[%s2327_s5 + $0x4c] sm:$0xf] %v221_v19  ;;  %v223_v20 = vld [vmem:[%s2323_s4 + $0xa0] sm:$0xf]  ;;  %v225_v21 = vld [vmem:[%s2323_s4 + $0xa8] sm:$0xf] }
  0x26   : > { %v227_v22 = vld [vmem:[%s2323_s4 + $0xb0] sm:$0xf]  ;;  %224 = vst [vmem:[%s2327_s5 + $0x50] sm:$0xf] %v223_v20  ;;  %226 = vst [vmem:[%s2327_s5 + $0x54] sm:$0xf] %v225_v21 }
  0x27   : > { %228 = vst [vmem:[%s2327_s5 + $0x58] sm:$0xf] %v227_v22  ;;  %v229_v23 = vld [vmem:[%s2323_s4 + $0xb8] sm:$0xf]  ;;  %v231_v24 = vld [vmem:[%s2323_s4 + $0xc0] sm:$0xf] }
  0x28   : > { %v233_v25 = vld [vmem:[%s2323_s4 + $0xc8] sm:$0xf]  ;;  %230 = vst [vmem:[%s2327_s5 + $0x5c] sm:$0xf] %v229_v23  ;;  %232 = vst [vmem:[%s2327_s5 + $0x60] sm:$0xf] %v231_v24 }
  0x29   : > { %234 = vst [vmem:[%s2327_s5 + $0x64] sm:$0xf] %v233_v25  ;;  %v235_v26 = vld [vmem:[%s2323_s4 + $0xd0] sm:$0xf]  ;;  %v237_v27 = vld [vmem:[%s2323_s4 + $0xd8] sm:$0xf] }
  0x2a   : > { %v239_v28 = vld [vmem:[%s2323_s4 + $0xe0] sm:$0xf]  ;;  %236 = vst [vmem:[%s2327_s5 + $0x68] sm:$0xf] %v235_v26  ;;  %238 = vst [vmem:[%s2327_s5 + $0x6c] sm:$0xf] %v237_v27 }
  0x2b   : > { %240 = vst [vmem:[%s2327_s5 + $0x70] sm:$0xf] %v239_v28  ;;  %v241_v29 = vld [vmem:[%s2323_s4 + $0xe8] sm:$0xf]  ;;  %v243_v30 = vld [vmem:[%s2323_s4 + $0xf0] sm:$0xf] }
  0x2c   : > { %v245_v31 = vld [vmem:[%s2323_s4 + $0xf8] sm:$0xf]  ;;  %242 = vst [vmem:[%s2327_s5 + $0x74] sm:$0xf] %v241_v29  ;;  %244 = vst [vmem:[%s2327_s5 + $0x78] sm:$0xf] %v243_v30 }
  0x2d   : > { %246 = vst [vmem:[%s2327_s5 + $0x7c] sm:$0xf] %v245_v31  ;;  %v247_v32 = vld [vmem:[%s2323_s4 + $0x100] sm:$0xf]  ;;  %v249_v33 = vld [vmem:[%s2323_s4 + $0x108] sm:$0xf] }
  0x2e   : > { %v251_v34 = vld [vmem:[%s2323_s4 + $0x110] sm:$0xf]  ;;  %248 = vst [vmem:[%s2327_s5 + $0x80] sm:$0xf] %v247_v32  ;;  %250 = vst [vmem:[%s2327_s5 + $0x84] sm:$0xf] %v249_v33 }
  0x2f   : > { %252 = vst [vmem:[%s2327_s5 + $0x88] sm:$0xf] %v251_v34  ;;  %v253_v35 = vld [vmem:[%s2323_s4 + $0x118] sm:$0xf]  ;;  %v255_v36 = vld [vmem:[%s2323_s4 + $0x120] sm:$0xf] }
  0x30   : > { %v257_v37 = vld [vmem:[%s2323_s4 + $0x128] sm:$0xf]  ;;  %254 = vst [vmem:[%s2327_s5 + $0x8c] sm:$0xf] %v253_v35  ;;  %256 = vst [vmem:[%s2327_s5 + $0x90] sm:$0xf] %v255_v36 }
  0x31   : > { %258 = vst [vmem:[%s2327_s5 + $0x94] sm:$0xf] %v257_v37  ;;  %v259_v38 = vld [vmem:[%s2323_s4 + $0x130] sm:$0xf]  ;;  %v261_v39 = vld [vmem:[%s2323_s4 + $0x138] sm:$0xf] }
  0x32   : > { %v263_v40 = vld [vmem:[%s2323_s4 + $0x140] sm:$0xf]  ;;  %260 = vst [vmem:[%s2327_s5 + $0x98] sm:$0xf] %v259_v38  ;;  %262 = vst [vmem:[%s2327_s5 + $0x9c] sm:$0xf] %v261_v39 }
  0x33   : > { %264 = vst [vmem:[%s2327_s5 + $0xa0] sm:$0xf] %v263_v40  ;;  %v265_v41 = vld [vmem:[%s2323_s4 + $0x148] sm:$0xf]  ;;  %v267_v42 = vld [vmem:[%s2323_s4 + $0x150] sm:$0xf] }
  0x34   : > { %v269_v43 = vld [vmem:[%s2323_s4 + $0x158] sm:$0xf]  ;;  %266 = vst [vmem:[%s2327_s5 + $0xa4] sm:$0xf] %v265_v41  ;;  %268 = vst [vmem:[%s2327_s5 + $0xa8] sm:$0xf] %v267_v42 }
  0x35   : > { %270 = vst [vmem:[%s2327_s5 + $0xac] sm:$0xf] %v269_v43  ;;  %v271_v44 = vld [vmem:[%s2323_s4 + $0x160] sm:$0xf]  ;;  %v273_v45 = vld [vmem:[%s2323_s4 + $0x168] sm:$0xf] }
  0x36   : > { %v275_v46 = vld [vmem:[%s2323_s4 + $0x170] sm:$0xf]  ;;  %272 = vst [vmem:[%s2327_s5 + $0xb0] sm:$0xf] %v271_v44  ;;  %274 = vst [vmem:[%s2327_s5 + $0xb4] sm:$0xf] %v273_v45 }
  0x37   : > { %276 = vst [vmem:[%s2327_s5 + $0xb8] sm:$0xf] %v275_v46  ;;  %v277_v47 = vld [vmem:[%s2323_s4 + $0x178] sm:$0xf]  ;;  %v279_v48 = vld [vmem:[%s2323_s4 + $0x180] sm:$0xf] }
  0x38   : > { %v281_v49 = vld [vmem:[%s2323_s4 + $0x188] sm:$0xf]  ;;  %278 = vst [vmem:[%s2327_s5 + $0xbc] sm:$0xf] %v277_v47  ;;  %280 = vst [vmem:[%s2327_s5 + $0xc0] sm:$0xf] %v279_v48 }
  0x39   : > { %282 = vst [vmem:[%s2327_s5 + $0xc4] sm:$0xf] %v281_v49  ;;  %v283_v50 = vld [vmem:[%s2323_s4 + $0x190] sm:$0xf]  ;;  %v285_v51 = vld [vmem:[%s2323_s4 + $0x198] sm:$0xf] }
  0x3a   : > { %v287_v52 = vld [vmem:[%s2323_s4 + $0x1a0] sm:$0xf]  ;;  %284 = vst [vmem:[%s2327_s5 + $0xc8] sm:$0xf] %v283_v50  ;;  %286 = vst [vmem:[%s2327_s5 + $0xcc] sm:$0xf] %v285_v51 }
  0x3b   : > { %288 = vst [vmem:[%s2327_s5 + $0xd0] sm:$0xf] %v287_v52  ;;  %v289_v53 = vld [vmem:[%s2323_s4 + $0x1a8] sm:$0xf]  ;;  %v291_v54 = vld [vmem:[%s2323_s4 + $0x1b0] sm:$0xf] }
  0x3c   : > { %v293_v55 = vld [vmem:[%s2323_s4 + $0x1b8] sm:$0xf]  ;;  %290 = vst [vmem:[%s2327_s5 + $0xd4] sm:$0xf] %v289_v53  ;;  %292 = vst [vmem:[%s2327_s5 + $0xd8] sm:$0xf] %v291_v54 }
  0x3d   : > { %294 = vst [vmem:[%s2327_s5 + $0xdc] sm:$0xf] %v293_v55  ;;  %v295_v56 = vld [vmem:[%s2323_s4 + $0x1c0] sm:$0xf]  ;;  %v297_v57 = vld [vmem:[%s2323_s4 + $0x1c8] sm:$0xf] }
  0x3e   : > { %v299_v58 = vld [vmem:[%s2323_s4 + $0x1d0] sm:$0xf]  ;;  %296 = vst [vmem:[%s2327_s5 + $0xe0] sm:$0xf] %v295_v56  ;;  %298 = vst [vmem:[%s2327_s5 + $0xe4] sm:$0xf] %v297_v57 }
  0x3f   : > { %300 = vst [vmem:[%s2327_s5 + $0xe8] sm:$0xf] %v299_v58  ;;  %v301_v59 = vld [vmem:[%s2323_s4 + $0x1d8] sm:$0xf]  ;;  %v303_v60 = vld [vmem:[%s2323_s4 + $0x1e0] sm:$0xf] }
  0x40   : > { %v305_v61 = vld [vmem:[%s2323_s4 + $0x1e8] sm:$0xf]  ;;  %302 = vst [vmem:[%s2327_s5 + $0xec] sm:$0xf] %v301_v59  ;;  %304 = vst [vmem:[%s2327_s5 + $0xf0] sm:$0xf] %v303_v60 }
  0x41   : > { %306 = vst [vmem:[%s2327_s5 + $0xf4] sm:$0xf] %v305_v61  ;;  %v307_v62 = vld [vmem:[%s2323_s4 + $0x1f0] sm:$0xf]  ;;  %v309_v63 = vld [vmem:[%s2323_s4 + $0x1f8] sm:$0xf] }
  0x42   : > { %308 = vst [vmem:[%s2327_s5 + $0xf8] sm:$0xf] %v307_v62  ;;  %310 = vst [vmem:[%s2327_s5 + $0xfc] sm:$0xf] %v309_v63 }
  0x43 PF: > { %p1643_p11 = scmp.ge.s32.totalorder %s2235_s17, 1  ;;  %p466_p12 = scmp.lt.s32.totalorder %s2235_s17, 3 }
  0x45   : > { %p467_p13 = pnand %p1643_p11, %p466_p12 }
  0x46   : > { %s473_s6 = sand.u32 (!%p467_p13), 1, %s2219_s13   ;;  %v2063_v0 = vld [vmem:[%s2821_s0 + $0x4] ss:$16 sps:$4 sm:$0xff] (!%p467_p13)   ;;  %v2066_v1 = vld [vmem:[%s2821_s0 + $0xc] ss:$16 sps:$4 sm:$0xff] (!%p467_p13)   ;;  %p512_p0 = scmp.lt.s32.totalorder (!%p467_p13), %s2227_s15, 1 }
  0x47   : > { %470 = sbr.rel (%p467_p13) target bundleno = 464 (0x1d0), region = 69  ;;  %s2460_s7 = sshll.u32 (!%p467_p13), %s473_s6, 8  ;;  %1196 = vmatprep.mubr.bf16.mxu0 (!%p467_p13), %v2063_v0  ;;  %1357 = vmatprep.mubr.bf16.mxu1 (!%p467_p13), %v2066_v1  ;;  %v2061_v32 = vld [vmem:[%s2821_s0] ss:$16 sps:$4 sm:$0xff] (!%p467_p13)   ;;  %v2064_v34 = vld [vmem:[%s2821_s0 + $0x8] ss:$16 sps:$4 sm:$0xff] (!%p467_p13)  }
  0x48   : > { %s2469_s18 = scalar_lea.vmem (!%p467_p13), [#allocation2], %s2460_s7  ;;  %v2067_v36 = vld [vmem:[%s2821_s0 + $0x24] ss:$16 sps:$4 sm:$0xff] (!%p467_p13)   ;;  %v2069_v37 = vld [vmem:[%s2821_s0 + $0x2c] ss:$16 sps:$4 sm:$0xff] (!%p467_p13)   ;;  %s2699_s4 = scalar_lea.vmem (!%p467_p13), [#allocation3], %s2460_s7 }
  0x49   : > { %v2029_v2 = vld [vmem:[%s2469_s18 + $0x40] sm:$0xff] (!%p467_p13)   ;;  %v2033_v6 = vld [vmem:[%s2469_s18 + $0x48] sm:$0xff] (!%p467_p13)   ;;  %v2037_v10 = vld [vmem:[%s2469_s18 + $0x50] sm:$0xff] (!%p467_p13)   ;;  %s1744_s7 = sshll.u32 (!%p467_p13), %s2227_s15, 7  ;;  %s1534_s5 = sshll.u32 (!%p467_p13), %s2699_s4, 4  ;;  %s2768_s5 = int_to_ptr.vmem [resolvable:$true] %s1534_s5 }
  0x4a   : > { %v2030_v3 = vld [vmem:[%s2469_s18 + $0xc0] sm:$0xff] (!%p467_p13)   ;;  %1747 = vmatprep.subr.bf16.mxu0 (!%p467_p13), %v2029_v2  ;;  %v2034_v7 = vld [vmem:[%s2469_s18 + $0xc8] sm:$0xff] (!%p467_p13)   ;;  %v2038_v11 = vld [vmem:[%s2469_s18 + $0xd0] sm:$0xff] (!%p467_p13)   ;;  %s2766_s10 = scalar_lea.hbm (!%p467_p13), %s2824_s3, %s1744_s7  ;;  %s2157_s11 = scalar_lea.vmem (!%p467_p13), %s2768_s5, 4096 }
  0x4b   : > { %v2031_v4 = vld [vmem:[%s2469_s18] sm:$0xff] (!%p467_p13)   ;;  %1859 = vmatprep.subr.bf16.mxu1 (!%p467_p13), %v2030_v3  ;;  %v2035_v8 = vld [vmem:[%s2469_s18 + $0x8] sm:$0xff] (!%p467_p13)   ;;  %v2039_v12 = vld [vmem:[%s2469_s18 + $0x10] sm:$0xff] (!%p467_p13)   ;;  %p2158_p1 = scmp.ne.s32.totalorder (!%p467_p13), %s2768_s5, %s2157_s11 }
  0x4c   : > { %v2032_v5 = vld [vmem:[%s2469_s18 + $0x80] sm:$0xff] (!%p467_p13)   ;;  %1748 = vmatpush3.bf16.msra.mxu0 (!%p467_p13), %v2031_v4  ;;  %v2036_v9 = vld [vmem:[%s2469_s18 + $0x88] sm:$0xff] (!%p467_p13)   ;;  %v2040_v13 = vld [vmem:[%s2469_s18 + $0x90] sm:$0xff] (!%p467_p13)  }
  0x4d   : > { %1860 = vmatpush3.bf16.msra.mxu1 (!%p467_p13), %v2032_v5  ;;  %1749 = vmatprep.subr.bf16.mxu0 (!%p467_p13), %v2033_v6  ;;  %v2041_v14 = vld [vmem:[%s2469_s18 + $0x58] sm:$0xff] (!%p467_p13)   ;;  %v2045_v18 = vld [vmem:[%s2469_s18 + $0x60] sm:$0xff] (!%p467_p13)   ;;  %v2049_v22 = vld [vmem:[%s2469_s18 + $0x68] sm:$0xff] (!%p467_p13)   ;;  %p2159_p2 = pnand (!%p467_p13), %p2158_p1, %p2300_p5 }
  0x4e   : > { %1861 = vmatprep.subr.bf16.mxu1 %v2034_v7  ;;  %v2042_v15 = vld [vmem:[%s2469_s18 + $0xd8] sm:$0xff]   ;;  %v2046_v19 = vld [vmem:[%s2469_s18 + $0xe0] sm:$0xff]   ;;  %v2050_v23 = vld [vmem:[%s2469_s18 + $0xe8] sm:$0xff]   ;;  %s513_s27 = scalar_select %p512_p0, %s2227_s15, 1 }
  0x4f   : > { %v2043_v16 = vld [vmem:[%s2469_s18 + $0x18] sm:$0xff]   ;;  %v2047_v20 = vld [vmem:[%s2469_s18 + $0x20] sm:$0xff]   ;;  %v2051_v24 = vld [vmem:[%s2469_s18 + $0x28] sm:$0xff]   ;;  %s2774_s15 = scalar_lea.sflag [#allocation4], %s473_s6  ;;  %p2160_p3 = pneg %p2159_p2 }
  0x50   : > { %1750 = vmatpush3.bf16.msra.mxu0 %v2035_v8  ;;  %v2044_v17 = vld [vmem:[%s2469_s18 + $0x98] sm:$0xff]   ;;  %v2048_v21 = vld [vmem:[%s2469_s18 + $0xa0] sm:$0xff]   ;;  %v2052_v25 = vld [vmem:[%s2469_s18 + $0xa8] sm:$0xff]   ;;  %s514_s30 = scalar_lea.vmem %s2823_s2, %s513_s27 }
  0x51   : > { %1862 = vmatpush3.bf16.msra.mxu1 %v2036_v9  ;;  %1751 = vmatprep.subr.bf16.mxu0 %v2037_v10  ;;  %v2053_v26 = vld [vmem:[%s2469_s18 + $0x70] sm:$0xff]   ;;  %v2057_v30 = vld [vmem:[%s2469_s18 + $0x78] sm:$0xff]  }
  0x52   : > { %1863 = vmatprep.subr.bf16.mxu1 %v2038_v11  ;;  %v2054_v27 = vld [vmem:[%s2469_s18 + $0xf0] sm:$0xff]   ;;  %v2058_v31 = vld [vmem:[%s2469_s18 + $0xf8] sm:$0xff]  }
  0x53   : > { %v2055_v28 = vld [vmem:[%s2469_s18 + $0x30] sm:$0xff]   ;;  %v2059_v33 = vld [vmem:[%s2469_s18 + $0x38] sm:$0xff]  }
  0x54   : > { %1752 = vmatpush3.bf16.msra.mxu0 %v2039_v12  ;;  %v2056_v29 = vld [vmem:[%s2469_s18 + $0xb0] sm:$0xff]   ;;  %v2060_v35 = vld [vmem:[%s2469_s18 + $0xb8] sm:$0xff]   ;;  %s2237_s18 = smov [#allocation3]  }
  0x55   : > { %1864 = vmatpush3.bf16.msra.mxu1 %v2040_v13  ;;  %1753 = vmatprep.subr.bf16.mxu0 %v2041_v14  ;;  %v2071_v38 = vld [vmem:[%s2821_s0 + $0x20] ss:$16 sps:$4 sm:$0xff]   ;;  %v2072_v39 = vld [vmem:[%s2821_s0 + $0x28] ss:$16 sps:$4 sm:$0xff]   ;;  %v2073_v40 = vld [vmem:[%s2821_s0 + $0x44] ss:$16 sps:$4 sm:$0xff]  }
  0x56   : > { %1865 = vmatprep.subr.bf16.mxu1 %v2042_v15  ;;  %v2075_v41 = vld [vmem:[%s2821_s0 + $0x4c] ss:$16 sps:$4 sm:$0xff]   ;;  %v2077_v42 = vld [vmem:[%s2821_s0 + $0x40] ss:$16 sps:$4 sm:$0xff]   ;;  %v2078_v43 = vld [vmem:[%s2821_s0 + $0x48] ss:$16 sps:$4 sm:$0xff]  }
  0x57   : > { %v2079_v44 = vld [vmem:[%s2821_s0 + $0x64] ss:$16 sps:$4 sm:$0xff]   ;;  %v2081_v45 = vld [vmem:[%s2821_s0 + $0x6c] ss:$16 sps:$4 sm:$0xff]   ;;  %v2083_v46 = vld [vmem:[%s2821_s0 + $0x60] ss:$16 sps:$4 sm:$0xff]  }
  0x58   : > { %1754 = vmatpush3.bf16.msra.mxu0 %v2043_v16  ;;  %v2084_v47 = vld [vmem:[%s2821_s0 + $0x68] ss:$16 sps:$4 sm:$0xff]   ;;  %v2085_v48 = vld [vmem:[%s2821_s0 + $0x84] ss:$16 sps:$4 sm:$0xff]   ;;  %v2087_v49 = vld [vmem:[%s2821_s0 + $0x8c] ss:$16 sps:$4 sm:$0xff]  }
  0x59   : > { %1866 = vmatpush3.bf16.msra.mxu1 %v2044_v17  ;;  %1755 = vmatprep.subr.bf16.mxu0 %v2045_v18  ;;  %v2089_v50 = vld [vmem:[%s2821_s0 + $0x80] ss:$16 sps:$4 sm:$0xff]   ;;  %v2090_v51 = vld [vmem:[%s2821_s0 + $0x88] ss:$16 sps:$4 sm:$0xff]   ;;  %v2091_v52 = vld [vmem:[%s2821_s0 + $0xa4] ss:$16 sps:$4 sm:$0xff]  }
  0x5a   : > { %1867 = vmatprep.subr.bf16.mxu1 %v2046_v19  ;;  %v2093_v53 = vld [vmem:[%s2821_s0 + $0xac] ss:$16 sps:$4 sm:$0xff]   ;;  %v2095_v54 = vld [vmem:[%s2821_s0 + $0xa0] ss:$16 sps:$4 sm:$0xff]   ;;  %v2096_v55 = vld [vmem:[%s2821_s0 + $0xa8] ss:$16 sps:$4 sm:$0xff]  }
  0x5b   : > { %v2097_v56 = vld [vmem:[%s2821_s0 + $0xc4] ss:$16 sps:$4 sm:$0xff]   ;;  %v2099_v57 = vld [vmem:[%s2821_s0 + $0xcc] ss:$16 sps:$4 sm:$0xff]   ;;  %v2101_v58 = vld [vmem:[%s2821_s0 + $0xc0] ss:$16 sps:$4 sm:$0xff]  }
  0x5c   : > { %1756 = vmatpush3.bf16.msra.mxu0 %v2047_v20  ;;  %v2102_v59 = vld [vmem:[%s2821_s0 + $0xc8] ss:$16 sps:$4 sm:$0xff]   ;;  %v2103_v60 = vld [vmem:[%s2821_s0 + $0xe4] ss:$16 sps:$4 sm:$0xff]   ;;  %v2105_v61 = vld [vmem:[%s2821_s0 + $0xec] ss:$16 sps:$4 sm:$0xff]  }
  0x5d   : > { %1868 = vmatpush3.bf16.msra.mxu1 %v2048_v21  ;;  %1757 = vmatprep.subr.bf16.mxu0 %v2049_v22  ;;  %v2107_v62 = vld [vmem:[%s2821_s0 + $0xe0] ss:$16 sps:$4 sm:$0xff]   ;;  %v2108_v63 = vld [vmem:[%s2821_s0 + $0xe8] ss:$16 sps:$4 sm:$0xff]   ;;  %v2109_v0 = vld [vmem:[%s2821_s0 + $0x104] ss:$16 sps:$4 sm:$0xff]  }
  0x5e   : > { %1869 = vmatprep.subr.bf16.mxu1 %v2050_v23  ;;  %v2111_v1 = vld [vmem:[%s2821_s0 + $0x10c] ss:$16 sps:$4 sm:$0xff]   ;;  %v2113_v2 = vld [vmem:[%s2821_s0 + $0x100] ss:$16 sps:$4 sm:$0xff]   ;;  %v2114_v3 = vld [vmem:[%s2821_s0 + $0x108] ss:$16 sps:$4 sm:$0xff]  }
  0x5f   : > { %v2115_v4 = vld [vmem:[%s2821_s0 + $0x124] ss:$16 sps:$4 sm:$0xff]   ;;  %v2117_v5 = vld [vmem:[%s2821_s0 + $0x12c] ss:$16 sps:$4 sm:$0xff]   ;;  %v2119_v6 = vld [vmem:[%s2821_s0 + $0x120] ss:$16 sps:$4 sm:$0xff]  }
  0x60   : > { %1758 = vmatpush3.bf16.msra.mxu0 %v2051_v24  ;;  %v2120_v7 = vld [vmem:[%s2821_s0 + $0x128] ss:$16 sps:$4 sm:$0xff]   ;;  %v2121_v8 = vld [vmem:[%s2821_s0 + $0x144] ss:$16 sps:$4 sm:$0xff]   ;;  %v2123_v9 = vld [vmem:[%s2821_s0 + $0x14c] ss:$16 sps:$4 sm:$0xff]  }
  0x61   : > { %1870 = vmatpush3.bf16.msra.mxu1 %v2052_v25  ;;  %1759 = vmatprep.subr.bf16.mxu0 %v2053_v26  ;;  %v2125_v10 = vld [vmem:[%s2821_s0 + $0x140] ss:$16 sps:$4 sm:$0xff]   ;;  %v2126_v11 = vld [vmem:[%s2821_s0 + $0x148] ss:$16 sps:$4 sm:$0xff]   ;;  %v2127_v12 = vld [vmem:[%s2821_s0 + $0x164] ss:$16 sps:$4 sm:$0xff]  }
  0x62   : > { %1871 = vmatprep.subr.bf16.mxu1 %v2054_v27  ;;  %v2129_v13 = vld [vmem:[%s2821_s0 + $0x16c] ss:$16 sps:$4 sm:$0xff]   ;;  %v2131_v14 = vld [vmem:[%s2821_s0 + $0x160] ss:$16 sps:$4 sm:$0xff]   ;;  %v2132_v15 = vld [vmem:[%s2821_s0 + $0x168] ss:$16 sps:$4 sm:$0xff]  }
  0x63   : > { %v2133_v16 = vld [vmem:[%s2821_s0 + $0x184] ss:$16 sps:$4 sm:$0xff]   ;;  %v2135_v17 = vld [vmem:[%s2821_s0 + $0x18c] ss:$16 sps:$4 sm:$0xff]   ;;  %v2137_v18 = vld [vmem:[%s2821_s0 + $0x180] ss:$16 sps:$4 sm:$0xff]  }
  0x64   : > { %1760 = vmatpush3.bf16.msra.mxu0 %v2055_v28  ;;  %v2138_v19 = vld [vmem:[%s2821_s0 + $0x188] ss:$16 sps:$4 sm:$0xff]   ;;  %v2139_v20 = vld [vmem:[%s2821_s0 + $0x1a4] ss:$16 sps:$4 sm:$0xff]   ;;  %v2141_v21 = vld [vmem:[%s2821_s0 + $0x1ac] ss:$16 sps:$4 sm:$0xff]  }
  0x65   : > { %1872 = vmatpush3.bf16.msra.mxu1 %v2056_v29  ;;  %1761 = vmatprep.subr.bf16.mxu0 %v2057_v30  ;;  %v2143_v22 = vld [vmem:[%s2821_s0 + $0x1a0] ss:$16 sps:$4 sm:$0xff]   ;;  %v2144_v23 = vld [vmem:[%s2821_s0 + $0x1a8] ss:$16 sps:$4 sm:$0xff]   ;;  %v2145_v24 = vld [vmem:[%s2821_s0 + $0x1c4] ss:$16 sps:$4 sm:$0xff]  }
  0x66   : > { %1873 = vmatprep.subr.bf16.mxu1 %v2058_v31  ;;  %v2147_v25 = vld [vmem:[%s2821_s0 + $0x1cc] ss:$16 sps:$4 sm:$0xff]   ;;  %v2149_v26 = vld [vmem:[%s2821_s0 + $0x1c0] ss:$16 sps:$4 sm:$0xff]   ;;  %v2150_v27 = vld [vmem:[%s2821_s0 + $0x1c8] ss:$16 sps:$4 sm:$0xff]  }
  0x67   : > { %v2151_v28 = vld [vmem:[%s2821_s0 + $0x1e4] ss:$16 sps:$4 sm:$0xff]   ;;  %v2153_v29 = vld [vmem:[%s2821_s0 + $0x1ec] ss:$16 sps:$4 sm:$0xff]   ;;  %v2155_v30 = vld [vmem:[%s2821_s0 + $0x1e0] ss:$16 sps:$4 sm:$0xff]  }
  0x68   : > { %1762 = vmatpush3.bf16.msra.mxu0 %v2059_v33  ;;  %v2156_v31 = vld [vmem:[%s2821_s0 + $0x1e8] ss:$16 sps:$4 sm:$0xff]   ;;  %s2161_s19 = sshll.u32 %s2237_s18, 4  ;;  %s2162_s19 = int_to_ptr.vmem [resolvable:$false] %s2161_s19 }
  0x69   : > { %1874 = vmatpush3.bf16.msra.mxu1 %v2060_v35  ;;  %s2163_s21 = scalar_lea.vmem %s2162_s19, 8192  ;;  %p2164_p4 = scmp.lt.s32.totalorder %s2768_s5, %s2162_s19 }
  0x6a   : > { %p2165_p6 = scmp.lt.s32.totalorder %s2163_s21, %s2157_s11 }
  0x6b   : > { %1197 = vmatmul.mubr.bf16.vlgmr.msra.gmra.mrb[0].mxu0 %v2061_v32 }
  0x6c   : > { %1358 = vmatmul.mubr.bf16.vlgmr.msra.gmra.mrb[0].mxu1 %v2064_v34  ;;  %1204 = vmatprep.mubr.bf16.mxu0 %v2067_v36  ;;  %v2694_v34 = vld [vmem:[%s514_s30] ss:$0 sm:$0xff]  ;;  %p2166_p7 = por %p2165_p6, %p2164_p4 }
  0x6d   : > { %1365 = vmatprep.mubr.bf16.mxu1 %v2069_v37 }
  0x6e   : > { %p2167_p8 = pnand %p2166_p7, %p2160_p3 }
  0x73   : > { %1205 = vmatmul.mubr.bf16.gmra.mrb[4].mxu0 %v2071_v38 }
  0x74   : > { %1366 = vmatmul.mubr.bf16.gmra.mrb[4].mxu1 %v2072_v39  ;;  %1212 = vmatprep.mubr.bf16.mxu0 %v2073_v40 }
  0x75   : > { %1373 = vmatprep.mubr.bf16.mxu1 %v2075_v41 }
  0x7b   : > { %1213 = vmatmul.mubr.bf16.gmra.mrb[8].mxu0 %v2077_v42 }
  0x7c   : > { %1374 = vmatmul.mubr.bf16.gmra.mrb[8].mxu1 %v2078_v43  ;;  %1220 = vmatprep.mubr.bf16.mxu0 %v2079_v44 }
  0x7d   : > { %1381 = vmatprep.mubr.bf16.mxu1 %v2081_v45 }
  0x83   : > { %1221 = vmatmul.mubr.bf16.gmra.mrb[12].mxu0 %v2083_v46 }
  0x84   : > { %1382 = vmatmul.mubr.bf16.gmra.mrb[12].mxu1 %v2084_v47  ;;  %1228 = vmatprep.mubr.bf16.mxu0 %v2085_v48 }
  0x85   : > { %1389 = vmatprep.mubr.bf16.mxu1 %v2087_v49 }
  0x8b   : > { %1229 = vmatmul.mubr.bf16.gmra.mrb[16].mxu0 %v2089_v50 }
  0x8c   : > { %1390 = vmatmul.mubr.bf16.gmra.mrb[16].mxu1 %v2090_v51  ;;  %1236 = vmatprep.mubr.bf16.mxu0 %v2091_v52 }
  0x8d   : > { %1397 = vmatprep.mubr.bf16.mxu1 %v2093_v53 }
  0x93   : > { %1237 = vmatmul.mubr.bf16.gmra.mrb[20].mxu0 %v2095_v54 }
  0x94   : > { %1398 = vmatmul.mubr.bf16.gmra.mrb[20].mxu1 %v2096_v55  ;;  %1244 = vmatprep.mubr.bf16.mxu0 %v2097_v56 }
  0x95   : > { %1405 = vmatprep.mubr.bf16.mxu1 %v2099_v57 }
  0x9b   : > { %1245 = vmatmul.mubr.bf16.gmra.mrb[24].mxu0 %v2101_v58 }
  0x9c   : > { %1406 = vmatmul.mubr.bf16.gmra.mrb[24].mxu1 %v2102_v59  ;;  %1252 = vmatprep.mubr.bf16.mxu0 %v2103_v60 }
  0x9d   : > { %1413 = vmatprep.mubr.bf16.mxu1 %v2105_v61 }
  0xa3   : > { %1253 = vmatmul.mubr.bf16.gmra.mrb[28].mxu0 %v2107_v62 }
  0xa4   : > { %1414 = vmatmul.mubr.bf16.gmra.mrb[28].mxu1 %v2108_v63  ;;  %1260 = vmatprep.mubr.bf16.mxu0 %v2109_v0 }
  0xa5   : > { %1421 = vmatprep.mubr.bf16.mxu1 %v2111_v1 }
  0xab   : > { %1261 = vmatmul.mubr.bf16.gmra.mrb[32].mxu0 %v2113_v2 }
  0xac   : > { %1422 = vmatmul.mubr.bf16.gmra.mrb[32].mxu1 %v2114_v3  ;;  %1268 = vmatprep.mubr.bf16.mxu0 %v2115_v4 }
  0xad   : > { %1429 = vmatprep.mubr.bf16.mxu1 %v2117_v5 }
  0xb3   : > { %1269 = vmatmul.mubr.bf16.gmra.mrb[36].mxu0 %v2119_v6 }
  0xb4   : > { %1430 = vmatmul.mubr.bf16.gmra.mrb[36].mxu1 %v2120_v7  ;;  %1276 = vmatprep.mubr.bf16.mxu0 %v2121_v8 }
  0xb5   : > { %1437 = vmatprep.mubr.bf16.mxu1 %v2123_v9 }
  0xbb   : > { %1277 = vmatmul.mubr.bf16.gmra.mrb[40].mxu0 %v2125_v10 }
  0xbc   : > { %1438 = vmatmul.mubr.bf16.gmra.mrb[40].mxu1 %v2126_v11  ;;  %1284 = vmatprep.mubr.bf16.mxu0 %v2127_v12 }
  0xbd   : > { %1445 = vmatprep.mubr.bf16.mxu1 %v2129_v13 }
  0xc3   : > { %1285 = vmatmul.mubr.bf16.gmra.mrb[44].mxu0 %v2131_v14 }
  0xc4   : > { %1446 = vmatmul.mubr.bf16.gmra.mrb[44].mxu1 %v2132_v15  ;;  %1292 = vmatprep.mubr.bf16.mxu0 %v2133_v16 }
  0xc5   : > { %1453 = vmatprep.mubr.bf16.mxu1 %v2135_v17 }
  0xcb   : > { %1293 = vmatmul.mubr.bf16.gmra.mrb[48].mxu0 %v2137_v18 }
  0xcc   : > { %1454 = vmatmul.mubr.bf16.gmra.mrb[48].mxu1 %v2138_v19  ;;  %1300 = vmatprep.mubr.bf16.mxu0 %v2139_v20 }
  0xcd   : > { %1461 = vmatprep.mubr.bf16.mxu1 %v2141_v21 }
  0xd3   : > { %1301 = vmatmul.mubr.bf16.gmra.mrb[52].mxu0 %v2143_v22 }
  0xd4   : > { %1462 = vmatmul.mubr.bf16.gmra.mrb[52].mxu1 %v2144_v23  ;;  %1308 = vmatprep.mubr.bf16.mxu0 %v2145_v24 }
  0xd5   : > { %1469 = vmatprep.mubr.bf16.mxu1 %v2147_v25 }
  0xdb   : > { %1309 = vmatmul.mubr.bf16.gmra.mrb[56].mxu0 %v2149_v26 }
  0xdc   : > { %1470 = vmatmul.mubr.bf16.gmra.mrb[56].mxu1 %v2150_v27  ;;  %1316 = vmatprep.mubr.bf16.mxu0 %v2151_v28 }
  0xdd   : > { %1477 = vmatprep.mubr.bf16.mxu1 %v2153_v29 }
  0xe3   : > { %1317 = vmatmul.mubr.bf16.gmra.mrb[60].mxu0 %v2155_v30 }
  0xe4   : > { %1478 = vmatmul.mubr.bf16.gmra.mrb[60].mxu1 %v2156_v31 }
 0x13e   : > { %v1763_v32 = vpop.f32.mrb[0].mxu0 }
 0x13f   : > { %v1875_v33 = vpop.f32.mrb[0].mxu1  ;;  %v1764_v35 = vpop.f32.mrb[1].mxu0 }
 0x140   : > { %v1765_v36 = vadd.f32 %v1764_v35, %v1763_v32  ;;  %v1876_v37 = vpop.f32.mrb[1].mxu1  ;;  %v1766_v38 = vpop.f32.mrb[2].mxu0 }
 0x141   : > { %v1877_v39 = vadd.f32 %v1876_v37, %v1875_v33  ;;  %v1878_v40 = vpop.f32.mrb[2].mxu1  ;;  %v1767_v41 = vpop.f32.mrb[3].mxu0 }
 0x142   : > { %v1199_v42 = vadd.f32 %v1765_v36, %v2694_v34  ;;  %v1768_v43 = vadd.f32 %v1767_v41, %v1766_v38  ;;  %v1879_v44 = vpop.f32.mrb[3].mxu1 }
 0x143   : > { %v1880_v45 = vadd.f32 %v1879_v44, %v1878_v40 }
 0x144   : > { %v1360_v46 = vadd.f32 %v1877_v39, %v1199_v42  ;;  %v1202_v47 = vadd.f32 %v1768_v43, %v2694_v34 }
 0x146   : > { %1486 = vst [vmem:[%s2699_s4] sm:$0xff] %v1360_v46  ;;  %v1363_v48 = vadd.f32 %v1880_v45, %v1202_v47  ;;  %v1769_v49 = vpop.f32.mrb[4].mxu0 }
 0x147   : > { %v1881_v50 = vpop.f32.mrb[4].mxu1  ;;  %v1770_v51 = vpop.f32.mrb[5].mxu0 }
 0x148   : > { %1487 = vst [vmem:[%s2699_s4 + $0x8] sm:$0xff] %v1363_v48  ;;  %v1771_v52 = vadd.f32 %v1770_v51, %v1769_v49  ;;  %v1882_v53 = vpop.f32.mrb[5].mxu1  ;;  %v1772_v54 = vpop.f32.mrb[6].mxu0 }
 0x149   : > { %v1883_v55 = vadd.f32 %v1882_v53, %v1881_v50  ;;  %v1884_v56 = vpop.f32.mrb[6].mxu1  ;;  %v1773_v57 = vpop.f32.mrb[7].mxu0 }
 0x14a   : > { %v1207_v58 = vadd.f32 %v1771_v52, %v2694_v34  ;;  %v1774_v59 = vadd.f32 %v1773_v57, %v1772_v54  ;;  %v1885_v60 = vpop.f32.mrb[7].mxu1 }
 0x14b   : > { %v1886_v61 = vadd.f32 %v1885_v60, %v1884_v56 }
 0x14c   : > { %v1368_v62 = vadd.f32 %v1883_v55, %v1207_v58  ;;  %v1210_v63 = vadd.f32 %v1774_v59, %v2694_v34 }
 0x14e   : > { %1488 = vst [vmem:[%s2699_s4 + $0x10] sm:$0xff] %v1368_v62  ;;  %v1371_v0 = vadd.f32 %v1886_v61, %v1210_v63  ;;  %v1775_v1 = vpop.f32.mrb[8].mxu0 }
 0x14f   : > { %v1887_v2 = vpop.f32.mrb[8].mxu1  ;;  %v1776_v3 = vpop.f32.mrb[9].mxu0 }
 0x150   : > { %1489 = vst [vmem:[%s2699_s4 + $0x18] sm:$0xff] %v1371_v0  ;;  %v1777_v4 = vadd.f32 %v1776_v3, %v1775_v1  ;;  %v1888_v5 = vpop.f32.mrb[9].mxu1  ;;  %v1778_v6 = vpop.f32.mrb[10].mxu0 }
 0x151   : > { %v1889_v7 = vadd.f32 %v1888_v5, %v1887_v2  ;;  %v1890_v8 = vpop.f32.mrb[10].mxu1  ;;  %v1779_v9 = vpop.f32.mrb[11].mxu0 }
 0x152   : > { %v1215_v10 = vadd.f32 %v1777_v4, %v2694_v34  ;;  %v1780_v11 = vadd.f32 %v1779_v9, %v1778_v6  ;;  %v1891_v12 = vpop.f32.mrb[11].mxu1 }
 0x153   : > { %v1892_v13 = vadd.f32 %v1891_v12, %v1890_v8 }
 0x154   : > { %v1376_v14 = vadd.f32 %v1889_v7, %v1215_v10  ;;  %v1218_v15 = vadd.f32 %v1780_v11, %v2694_v34 }
 0x156   : > { %1490 = vst [vmem:[%s2699_s4 + $0x20] sm:$0xff] %v1376_v14  ;;  %v1379_v16 = vadd.f32 %v1892_v13, %v1218_v15  ;;  %v1781_v17 = vpop.f32.mrb[12].mxu0 }
 0x157   : > { %v1893_v18 = vpop.f32.mrb[12].mxu1  ;;  %v1782_v19 = vpop.f32.mrb[13].mxu0 }
 0x158   : > { %1491 = vst [vmem:[%s2699_s4 + $0x28] sm:$0xff] %v1379_v16  ;;  %v1783_v20 = vadd.f32 %v1782_v19, %v1781_v17  ;;  %v1894_v21 = vpop.f32.mrb[13].mxu1  ;;  %v1784_v22 = vpop.f32.mrb[14].mxu0 }
 0x159   : > { %v1895_v23 = vadd.f32 %v1894_v21, %v1893_v18  ;;  %v1896_v24 = vpop.f32.mrb[14].mxu1  ;;  %v1785_v25 = vpop.f32.mrb[15].mxu0 }
 0x15a   : > { %v1223_v26 = vadd.f32 %v1783_v20, %v2694_v34  ;;  %v1786_v27 = vadd.f32 %v1785_v25, %v1784_v22  ;;  %v1897_v28 = vpop.f32.mrb[15].mxu1 }
 0x15b   : > { %v1898_v29 = vadd.f32 %v1897_v28, %v1896_v24 }
 0x15c   : > { %v1384_v30 = vadd.f32 %v1895_v23, %v1223_v26  ;;  %v1226_v31 = vadd.f32 %v1786_v27, %v2694_v34 }
 0x15e   : > { %1492 = vst [vmem:[%s2699_s4 + $0x30] sm:$0xff] %v1384_v30  ;;  %v1387_v32 = vadd.f32 %v1898_v29, %v1226_v31  ;;  %v1787_v33 = vpop.f32.mrb[16].mxu0 }
 0x15f   : > { %v1899_v35 = vpop.f32.mrb[16].mxu1  ;;  %v1788_v36 = vpop.f32.mrb[17].mxu0 }
 0x160   : > { %1493 = vst [vmem:[%s2699_s4 + $0x38] sm:$0xff] %v1387_v32  ;;  %v1789_v37 = vadd.f32 %v1788_v36, %v1787_v33  ;;  %v1900_v38 = vpop.f32.mrb[17].mxu1  ;;  %v1790_v39 = vpop.f32.mrb[18].mxu0 }
 0x161   : > { %v1901_v40 = vadd.f32 %v1900_v38, %v1899_v35  ;;  %v1902_v41 = vpop.f32.mrb[18].mxu1  ;;  %v1791_v42 = vpop.f32.mrb[19].mxu0 }
 0x162   : > { %v1231_v43 = vadd.f32 %v1789_v37, %v2694_v34  ;;  %v1792_v44 = vadd.f32 %v1791_v42, %v1790_v39  ;;  %v1903_v45 = vpop.f32.mrb[19].mxu1 }
 0x163   : > { %v1904_v46 = vadd.f32 %v1903_v45, %v1902_v41 }
 0x164   : > { %v1392_v47 = vadd.f32 %v1901_v40, %v1231_v43  ;;  %v1234_v48 = vadd.f32 %v1792_v44, %v2694_v34 }
 0x166   : > { %1494 = vst [vmem:[%s2699_s4 + $0x40] sm:$0xff] %v1392_v47  ;;  %v1395_v49 = vadd.f32 %v1904_v46, %v1234_v48  ;;  %v1793_v50 = vpop.f32.mrb[20].mxu0 }
 0x167   : > { %v1905_v51 = vpop.f32.mrb[20].mxu1  ;;  %v1794_v52 = vpop.f32.mrb[21].mxu0 }
 0x168   : > { %1495 = vst [vmem:[%s2699_s4 + $0x48] sm:$0xff] %v1395_v49  ;;  %v1795_v53 = vadd.f32 %v1794_v52, %v1793_v50  ;;  %v1906_v54 = vpop.f32.mrb[21].mxu1  ;;  %v1796_v55 = vpop.f32.mrb[22].mxu0 }
 0x169   : > { %v1907_v56 = vadd.f32 %v1906_v54, %v1905_v51  ;;  %v1908_v57 = vpop.f32.mrb[22].mxu1  ;;  %v1797_v58 = vpop.f32.mrb[23].mxu0 }
 0x16a   : > { %v1239_v59 = vadd.f32 %v1795_v53, %v2694_v34  ;;  %v1798_v60 = vadd.f32 %v1797_v58, %v1796_v55  ;;  %v1909_v61 = vpop.f32.mrb[23].mxu1 }
 0x16b   : > { %v1910_v62 = vadd.f32 %v1909_v61, %v1908_v57 }
 0x16c   : > { %v1400_v63 = vadd.f32 %v1907_v56, %v1239_v59  ;;  %v1242_v0 = vadd.f32 %v1798_v60, %v2694_v34 }
 0x16e   : > { %1496 = vst [vmem:[%s2699_s4 + $0x50] sm:$0xff] %v1400_v63  ;;  %v1403_v1 = vadd.f32 %v1910_v62, %v1242_v0  ;;  %v1799_v2 = vpop.f32.mrb[24].mxu0 }
 0x16f   : > { %v1911_v3 = vpop.f32.mrb[24].mxu1  ;;  %v1800_v4 = vpop.f32.mrb[25].mxu0 }
 0x170   : > { %1497 = vst [vmem:[%s2699_s4 + $0x58] sm:$0xff] %v1403_v1  ;;  %v1801_v5 = vadd.f32 %v1800_v4, %v1799_v2  ;;  %v1912_v6 = vpop.f32.mrb[25].mxu1  ;;  %v1802_v7 = vpop.f32.mrb[26].mxu0 }
 0x171   : > { %v1913_v8 = vadd.f32 %v1912_v6, %v1911_v3  ;;  %v1914_v9 = vpop.f32.mrb[26].mxu1  ;;  %v1803_v10 = vpop.f32.mrb[27].mxu0 }
 0x172   : > { %v1247_v11 = vadd.f32 %v1801_v5, %v2694_v34  ;;  %v1804_v12 = vadd.f32 %v1803_v10, %v1802_v7  ;;  %v1915_v13 = vpop.f32.mrb[27].mxu1 }
 0x173   : > { %v1916_v14 = vadd.f32 %v1915_v13, %v1914_v9 }
 0x174   : > { %v1408_v15 = vadd.f32 %v1913_v8, %v1247_v11  ;;  %v1250_v16 = vadd.f32 %v1804_v12, %v2694_v34 }
 0x176   : > { %1498 = vst [vmem:[%s2699_s4 + $0x60] sm:$0xff] %v1408_v15  ;;  %v1411_v17 = vadd.f32 %v1916_v14, %v1250_v16  ;;  %v1805_v18 = vpop.f32.mrb[28].mxu0 }
 0x177   : > { %v1917_v19 = vpop.f32.mrb[28].mxu1  ;;  %v1806_v20 = vpop.f32.mrb[29].mxu0 }
 0x178   : > { %1499 = vst [vmem:[%s2699_s4 + $0x68] sm:$0xff] %v1411_v17  ;;  %v1807_v21 = vadd.f32 %v1806_v20, %v1805_v18  ;;  %v1918_v22 = vpop.f32.mrb[29].mxu1  ;;  %v1808_v23 = vpop.f32.mrb[30].mxu0 }
 0x179   : > { %v1919_v24 = vadd.f32 %v1918_v22, %v1917_v19  ;;  %v1920_v25 = vpop.f32.mrb[30].mxu1  ;;  %v1809_v26 = vpop.f32.mrb[31].mxu0 }
 0x17a   : > { %v1255_v27 = vadd.f32 %v1807_v21, %v2694_v34  ;;  %v1810_v28 = vadd.f32 %v1809_v26, %v1808_v23  ;;  %v1921_v29 = vpop.f32.mrb[31].mxu1 }
 0x17b   : > { %v1922_v30 = vadd.f32 %v1921_v29, %v1920_v25 }
 0x17c   : > { %v1416_v31 = vadd.f32 %v1919_v24, %v1255_v27  ;;  %v1258_v32 = vadd.f32 %v1810_v28, %v2694_v34 }
 0x17e   : > { %1500 = vst [vmem:[%s2699_s4 + $0x70] sm:$0xff] %v1416_v31  ;;  %v1419_v33 = vadd.f32 %v1922_v30, %v1258_v32  ;;  %v1811_v35 = vpop.f32.mrb[32].mxu0 }
 0x17f   : > { %v1923_v36 = vpop.f32.mrb[32].mxu1  ;;  %v1812_v37 = vpop.f32.mrb[33].mxu0 }
 0x180   : > { %1501 = vst [vmem:[%s2699_s4 + $0x78] sm:$0xff] %v1419_v33  ;;  %v1813_v38 = vadd.f32 %v1812_v37, %v1811_v35  ;;  %v1924_v39 = vpop.f32.mrb[33].mxu1  ;;  %v1814_v40 = vpop.f32.mrb[34].mxu0 }
 0x181   : > { %v1925_v41 = vadd.f32 %v1924_v39, %v1923_v36  ;;  %v1926_v42 = vpop.f32.mrb[34].mxu1  ;;  %v1815_v43 = vpop.f32.mrb[35].mxu0 }
 0x182   : > { %v1263_v44 = vadd.f32 %v1813_v38, %v2694_v34  ;;  %v1816_v45 = vadd.f32 %v1815_v43, %v1814_v40  ;;  %v1927_v46 = vpop.f32.mrb[35].mxu1 }
 0x183   : > { %v1928_v47 = vadd.f32 %v1927_v46, %v1926_v42 }
 0x184   : > { %v1424_v48 = vadd.f32 %v1925_v41, %v1263_v44  ;;  %v1266_v49 = vadd.f32 %v1816_v45, %v2694_v34 }
 0x186   : > { %1502 = vst [vmem:[%s2699_s4 + $0x80] sm:$0xff] %v1424_v48  ;;  %v1427_v50 = vadd.f32 %v1928_v47, %v1266_v49  ;;  %v1817_v51 = vpop.f32.mrb[36].mxu0 }
 0x187   : > { %v1929_v52 = vpop.f32.mrb[36].mxu1  ;;  %v1818_v53 = vpop.f32.mrb[37].mxu0 }
 0x188   : > { %1503 = vst [vmem:[%s2699_s4 + $0x88] sm:$0xff] %v1427_v50  ;;  %v1819_v54 = vadd.f32 %v1818_v53, %v1817_v51  ;;  %v1930_v55 = vpop.f32.mrb[37].mxu1  ;;  %v1820_v56 = vpop.f32.mrb[38].mxu0 }
 0x189   : > { %v1931_v57 = vadd.f32 %v1930_v55, %v1929_v52  ;;  %v1932_v58 = vpop.f32.mrb[38].mxu1  ;;  %v1821_v59 = vpop.f32.mrb[39].mxu0 }
 0x18a   : > { %v1271_v60 = vadd.f32 %v1819_v54, %v2694_v34  ;;  %v1822_v61 = vadd.f32 %v1821_v59, %v1820_v56  ;;  %v1933_v62 = vpop.f32.mrb[39].mxu1 }
 0x18b   : > { %v1934_v63 = vadd.f32 %v1933_v62, %v1932_v58 }
 0x18c   : > { %v1432_v0 = vadd.f32 %v1931_v57, %v1271_v60  ;;  %v1274_v1 = vadd.f32 %v1822_v61, %v2694_v34 }
 0x18e   : > { %1504 = vst [vmem:[%s2699_s4 + $0x90] sm:$0xff] %v1432_v0  ;;  %v1435_v2 = vadd.f32 %v1934_v63, %v1274_v1  ;;  %v1823_v3 = vpop.f32.mrb[40].mxu0 }
 0x18f   : > { %v1935_v4 = vpop.f32.mrb[40].mxu1  ;;  %v1824_v5 = vpop.f32.mrb[41].mxu0 }
 0x190   : > { %1505 = vst [vmem:[%s2699_s4 + $0x98] sm:$0xff] %v1435_v2  ;;  %v1825_v6 = vadd.f32 %v1824_v5, %v1823_v3  ;;  %v1936_v7 = vpop.f32.mrb[41].mxu1  ;;  %v1826_v8 = vpop.f32.mrb[42].mxu0 }
 0x191   : > { %v1937_v9 = vadd.f32 %v1936_v7, %v1935_v4  ;;  %v1938_v10 = vpop.f32.mrb[42].mxu1  ;;  %v1827_v11 = vpop.f32.mrb[43].mxu0 }
 0x192   : > { %v1279_v12 = vadd.f32 %v1825_v6, %v2694_v34  ;;  %v1828_v13 = vadd.f32 %v1827_v11, %v1826_v8  ;;  %v1939_v14 = vpop.f32.mrb[43].mxu1 }
 0x193   : > { %v1940_v15 = vadd.f32 %v1939_v14, %v1938_v10 }
 0x194   : > { %v1440_v16 = vadd.f32 %v1937_v9, %v1279_v12  ;;  %v1282_v17 = vadd.f32 %v1828_v13, %v2694_v34 }
 0x196   : > { %1506 = vst [vmem:[%s2699_s4 + $0xa0] sm:$0xff] %v1440_v16  ;;  %v1443_v18 = vadd.f32 %v1940_v15, %v1282_v17  ;;  %v1829_v19 = vpop.f32.mrb[44].mxu0 }
 0x197   : > { %v1941_v20 = vpop.f32.mrb[44].mxu1  ;;  %v1830_v21 = vpop.f32.mrb[45].mxu0 }
 0x198   : > { %1507 = vst [vmem:[%s2699_s4 + $0xa8] sm:$0xff] %v1443_v18  ;;  %v1831_v22 = vadd.f32 %v1830_v21, %v1829_v19  ;;  %v1942_v23 = vpop.f32.mrb[45].mxu1  ;;  %v1832_v24 = vpop.f32.mrb[46].mxu0 }
 0x199   : > { %v1943_v25 = vadd.f32 %v1942_v23, %v1941_v20  ;;  %v1944_v26 = vpop.f32.mrb[46].mxu1  ;;  %v1833_v27 = vpop.f32.mrb[47].mxu0 }
 0x19a   : > { %v1287_v28 = vadd.f32 %v1831_v22, %v2694_v34  ;;  %v1834_v29 = vadd.f32 %v1833_v27, %v1832_v24  ;;  %v1945_v30 = vpop.f32.mrb[47].mxu1 }
 0x19b   : > { %v1946_v31 = vadd.f32 %v1945_v30, %v1944_v26 }
 0x19c   : > { %v1448_v32 = vadd.f32 %v1943_v25, %v1287_v28  ;;  %v1290_v33 = vadd.f32 %v1834_v29, %v2694_v34 }
 0x19e   : > { %1508 = vst [vmem:[%s2699_s4 + $0xb0] sm:$0xff] %v1448_v32  ;;  %v1451_v35 = vadd.f32 %v1946_v31, %v1290_v33  ;;  %v1835_v36 = vpop.f32.mrb[48].mxu0 }
 0x19f   : > { %v1947_v37 = vpop.f32.mrb[48].mxu1  ;;  %v1836_v38 = vpop.f32.mrb[49].mxu0 }
 0x1a0   : > { %1509 = vst [vmem:[%s2699_s4 + $0xb8] sm:$0xff] %v1451_v35  ;;  %v1837_v39 = vadd.f32 %v1836_v38, %v1835_v36  ;;  %v1948_v40 = vpop.f32.mrb[49].mxu1  ;;  %v1838_v41 = vpop.f32.mrb[50].mxu0 }
 0x1a1   : > { %v1949_v42 = vadd.f32 %v1948_v40, %v1947_v37  ;;  %v1950_v43 = vpop.f32.mrb[50].mxu1  ;;  %v1839_v44 = vpop.f32.mrb[51].mxu0 }
 0x1a2   : > { %v1295_v45 = vadd.f32 %v1837_v39, %v2694_v34  ;;  %v1840_v46 = vadd.f32 %v1839_v44, %v1838_v41  ;;  %v1951_v47 = vpop.f32.mrb[51].mxu1 }
 0x1a3   : > { %v1952_v48 = vadd.f32 %v1951_v47, %v1950_v43 }
 0x1a4   : > { %v1456_v49 = vadd.f32 %v1949_v42, %v1295_v45  ;;  %v1298_v50 = vadd.f32 %v1840_v46, %v2694_v34 }
 0x1a6   : > { %1510 = vst [vmem:[%s2699_s4 + $0xc0] sm:$0xff] %v1456_v49  ;;  %v1459_v51 = vadd.f32 %v1952_v48, %v1298_v50  ;;  %v1841_v52 = vpop.f32.mrb[52].mxu0 }
 0x1a7   : > { %v1953_v53 = vpop.f32.mrb[52].mxu1  ;;  %v1842_v54 = vpop.f32.mrb[53].mxu0 }
 0x1a8   : > { %1511 = vst [vmem:[%s2699_s4 + $0xc8] sm:$0xff] %v1459_v51  ;;  %v1843_v55 = vadd.f32 %v1842_v54, %v1841_v52  ;;  %v1954_v56 = vpop.f32.mrb[53].mxu1  ;;  %v1844_v57 = vpop.f32.mrb[54].mxu0 }
 0x1a9   : > { %v1955_v58 = vadd.f32 %v1954_v56, %v1953_v53  ;;  %v1956_v59 = vpop.f32.mrb[54].mxu1  ;;  %v1845_v60 = vpop.f32.mrb[55].mxu0 }
 0x1aa   : > { %v1303_v61 = vadd.f32 %v1843_v55, %v2694_v34  ;;  %v1846_v62 = vadd.f32 %v1845_v60, %v1844_v57  ;;  %v1957_v63 = vpop.f32.mrb[55].mxu1 }
 0x1ab   : > { %v1958_v0 = vadd.f32 %v1957_v63, %v1956_v59 }
 0x1ac   : > { %v1464_v1 = vadd.f32 %v1955_v58, %v1303_v61  ;;  %v1306_v2 = vadd.f32 %v1846_v62, %v2694_v34 }
 0x1ae   : > { %1512 = vst [vmem:[%s2699_s4 + $0xd0] sm:$0xff] %v1464_v1  ;;  %v1467_v3 = vadd.f32 %v1958_v0, %v1306_v2  ;;  %v1847_v4 = vpop.f32.mrb[56].mxu0 }
 0x1af   : > { %v1959_v5 = vpop.f32.mrb[56].mxu1  ;;  %v1848_v6 = vpop.f32.mrb[57].mxu0 }
 0x1b0   : > { %1513 = vst [vmem:[%s2699_s4 + $0xd8] sm:$0xff] %v1467_v3  ;;  %v1849_v7 = vadd.f32 %v1848_v6, %v1847_v4  ;;  %v1960_v8 = vpop.f32.mrb[57].mxu1  ;;  %v1850_v9 = vpop.f32.mrb[58].mxu0 }
 0x1b1   : > { %v1961_v10 = vadd.f32 %v1960_v8, %v1959_v5  ;;  %v1962_v11 = vpop.f32.mrb[58].mxu1  ;;  %v1851_v12 = vpop.f32.mrb[59].mxu0 }
 0x1b2   : > { %v1311_v13 = vadd.f32 %v1849_v7, %v2694_v34  ;;  %v1852_v14 = vadd.f32 %v1851_v12, %v1850_v9  ;;  %v1963_v15 = vpop.f32.mrb[59].mxu1 }
 0x1b3   : > { %v1964_v16 = vadd.f32 %v1963_v15, %v1962_v11 }
 0x1b4   : > { %v1472_v17 = vadd.f32 %v1961_v10, %v1311_v13  ;;  %v1314_v18 = vadd.f32 %v1852_v14, %v2694_v34 }
 0x1b6   : > { %1514 = vst [vmem:[%s2699_s4 + $0xe0] sm:$0xff] %v1472_v17  ;;  %v1475_v19 = vadd.f32 %v1964_v16, %v1314_v18  ;;  %v1853_v20 = vpop.f32.mrb[60].mxu0 }
 0x1b7   : > { %v1965_v21 = vpop.f32.mrb[60].mxu1  ;;  %v1854_v22 = vpop.f32.mrb[61].mxu0 }
 0x1b8   : > { %1515 = vst [vmem:[%s2699_s4 + $0xe8] sm:$0xff] %v1475_v19  ;;  %v1855_v23 = vadd.f32 %v1854_v22, %v1853_v20  ;;  %v1966_v24 = vpop.f32.mrb[61].mxu1  ;;  %v1856_v25 = vpop.f32.mrb[62].mxu0 }
 0x1b9   : > { %v1967_v26 = vadd.f32 %v1966_v24, %v1965_v21  ;;  %v1968_v27 = vpop.f32.mrb[62].mxu1  ;;  %v1857_v28 = vpop.f32.mrb[63].mxu0 }
 0x1ba   : > { %v1319_v29 = vadd.f32 %v1855_v23, %v2694_v34  ;;  %v1858_v30 = vadd.f32 %v1857_v28, %v1856_v25  ;;  %v1969_v31 = vpop.f32.mrb[63].mxu1 }
 0x1bb   : > { %v1970_v32 = vadd.f32 %v1969_v31, %v1968_v27 }
 0x1bc   : > { %v1480_v33 = vadd.f32 %v1967_v26, %v1319_v29  ;;  %v1322_v35 = vadd.f32 %v1858_v30, %v2694_v34 }
 0x1be   : > { %1516 = vst [vmem:[%s2699_s4 + $0xf0] sm:$0xff] %v1480_v33  ;;  %v1483_v36 = vadd.f32 %v1970_v32, %v1322_v35 }
 0x1c0   : > { %1517 = vst [vmem:[%s2699_s4 + $0xf8] sm:$0xff] %v1483_v36 }
 0x1c1   : > { %2170 = shalt.err (!%p2167_p8)
}
 0x1c2   : > { %s2171_s6 = scalar_lea.hbm %s2766_s10, 4096  ;;  %s2175_s27 = scalar_lea.hbm %s2824_s3, 8192 }
 0x1c3   : > { %p2172_p11 = scmp.ne.s32.totalorder %s2766_s10, %s2171_s6  ;;  %p2176_p0 = scmp.lt.u32.totalorder %s2766_s10, %s2824_s3 }
 0x1c4   : > { %p2177_p1 = scmp.lt.u32.totalorder %s2175_s27, %s2171_s6  ;;  %p2179_p3 = scmp.lt.u32.totalorder %s2171_s6, %s2766_s10 }
 0x1c5   : > { %p2173_p12 = pnand %p2172_p11, %p2300_p5 }
 0x1c6   : > { %p2178_p2 = por %p2177_p1, %p2176_p0 }
 0x1c7   : > { %p2174_p13 = pneg %p2173_p12 }
 0x1c8   : > { %p2180_p4 = por %p2179_p3, %p2178_p2 }
 0x1ca   : > { %p2181_p6 = pnand %p2180_p4, %p2174_p13 }
 0x1cc   : > { %2184 = shalt.err (!%p2181_p6)
}
 0x1cd   : > { %s2238_s30 = smov 128   ;;  %s2239_s4 = smov 256  }
 0x1ce   : > { %s2240_s7 = smov 8  }
 0x1cf   : > { %1971 = dma.vmem_to_hbm [thread:$0]  (%p2300_p5), %s2768_s5, 4096, %s2766_s10, %s2774_s15, %s2238_s30, %s2239_s4, %s2240_s7  }
 0x1d0 PF: > { %s1549_s8 = sand.u32 1, %s2215_s12   ;;  %p1974_p7 = pnand %p1640_p10, %p2311_p9 }
 0x1d1   : > { %s1550_s9 = scalar_lea.sflag [#allocation4], %s1549_s8 }
 0x1d2   : > { %2210 = dma.done.wait (!%p1974_p7), %s1550_s9, 4096  }
 0x1d3   : > { %2212 = vsyncadd (!%p1974_p7), %s1550_s9, 4294963200  ;;  %s16_s17 = sadd.s32 1, %s2235_s17   ;;  %s2827_s12 = smov %s2219_s13 }
 0x1d4   : > { %p13_p8 = scmp.ge.s32.totalorder %s16_s17, 4   ;;  %s2828_s13 = smov %s2223_s14 }
 0x1d5   : > { %s2829_s14 = smov %s2309_s24  ;;  %s2830_s15 = smov %s2231_s16 }
 0x1d6   : > { %s2831_s16 = smov %s2833_s20  ;;  %15 = sbr.rel (!%p13_p8) target bundleno = 4 (0x4), region = 119 }
 0x1dd   :  { %1555 = vsyncpa [#allocation4], 1 }
 0x1de   :  { %1557 = vsyncpa [#allocation4 + $0x1], 1 }

</bundles_post_ra>
